<compile_context>
chip_gen: v7x
topology: tpu7x:2x2x1
jax: 0.10.0
libtpu: 0.0.40
codegen_flags: <defaults>
</compile_context>

<pallas_src>
import jax
import jax.numpy as jnp
from jax.experimental import pallas as pl
from jax.experimental.pallas import tpu as pltpu


def _angle_resnet_block_kernel(x_ref, w1_ref, b1_ref, w2_ref, b2_ref, o_ref):
    # x_ref: (tm, C) x.dtype   w*_ref: (C, C) f32 (grid-resident)
    # b*_ref: (1, C) f32       o_ref: (tm, C) x.dtype
    h = jnp.maximum(x_ref[...].astype(jnp.float32), 0.0)              # ReLU
    h = jnp.dot(h, w1_ref[...],
                preferred_element_type=jnp.float32) + b1_ref[...]     # linear_1
    h = jnp.maximum(h, 0.0)                                           # ReLU
    h = jnp.dot(h, w2_ref[...],
                preferred_element_type=jnp.float32) + b2_ref[...]     # linear_2
    # Residual: re-read the resident VMEM x tile (cheap vld, short live range).
    o_ref[...] = (h + x_ref[...].astype(jnp.float32)).astype(o_ref.dtype)


def _round_up(n, m):
    return ((n + m - 1) // m) * m


def prepare_angle_resnet_params(w1, b1, w2, b2):
    """One-time parameter prep (hoisted off the per-call hot path).

    w1/w2: (C, C) in PyTorch (out, in) convention.  b1/b2: (C,).
    Returns (w1_t, b1_2d, w2_t, b2_2d) ready for angle_resnet_block_prepared.
    """
    C = w1.shape[0]
    w1_t = jnp.asarray(w1, jnp.float32).T          # PyTorch does x @ W.T
    w2_t = jnp.asarray(w2, jnp.float32).T
    b1_2d = jnp.asarray(b1, jnp.float32).reshape(1, C)
    b2_2d = jnp.asarray(b2, jnp.float32).reshape(1, C)
    return w1_t, b1_2d, w2_t, b2_2d


def angle_resnet_block_prepared(x, w1_t, b1_2d, w2_t, b2_2d, *, tm=2048):
    """x: (..., C), any float dtype.  Params from prepare_angle_resnet_params.
    Returns array with the same shape/dtype as x."""
    orig_shape = x.shape
    C = orig_shape[-1]
    assert C % 128 == 0, "c_resnet must be a multiple of 128 for this kernel"

    x2d = x.reshape(-1, C)                      # native dtype, no extra HBM pass
    rows = x2d.shape[0]

    # Row tile: large by default to amortize per-step pipeline overhead, capped
    # at 4096 so double-buffered tiles stay inside v5e's 16 MiB scoped-VMEM
    # default, clamped (to a multiple of 8) for small inputs.  No padding: the
    # partial last block is masked by Pallas on writeback.
    tm = min(tm, 4096)
    tm_eff = max(8, min(_round_up(tm, 8), _round_up(rows, 8)))
    # v7x megacore: keep at least 2 parallel grid steps when there is enough
    # work, so both TensorCores get a share (no-op on v5e/v6e single-TC chips).
    if rows > 1024 and pl.cdiv(rows, tm_eff) < 2:
        tm_eff = max(8, _round_up(pl.cdiv(rows, 2), 8))
    grid = (pl.cdiv(rows, tm_eff),)

    out = pl.pallas_call(
        _angle_resnet_block_kernel,
        out_shape=jax.ShapeDtypeStruct((rows, C), x.dtype),
        grid_spec=pltpu.PrefetchScalarGridSpec(
            num_scalar_prefetch=0,
            grid=grid,
            in_specs=[
                pl.BlockSpec((tm_eff, C), lambda i: (i, 0)),   # x tile (native dtype)
                pl.BlockSpec((C, C), lambda i: (0, 0)),        # W1^T (resident, f32)
                pl.BlockSpec((1, C), lambda i: (0, 0)),        # b1
                pl.BlockSpec((C, C), lambda i: (0, 0)),        # W2^T (resident, f32)
                pl.BlockSpec((1, C), lambda i: (0, 0)),        # b2
            ],
            out_specs=pl.BlockSpec((tm_eff, C), lambda i: (i, 0)),
        ),
        compiler_params=pltpu.CompilerParams(
            dimension_semantics=("parallel",)),
    )(x2d, w1_t, b1_2d, w2_t, b2_2d)

    return out.reshape(orig_shape)


def angle_resnet_block(x, w1, b1, w2, b2, *, tm=2048):
    """Convenience wrapper taking raw PyTorch-convention params."""
    params = prepare_angle_resnet_params(w1, b1, w2, b2)
    return angle_resnet_block_prepared(x, *params, tm=tm)


def _reference(x, w1, b1, w2, b2):
    xf = x.astype(jnp.float32)
    h = jnp.maximum(xf, 0.0)
    h = h @ w1.T + b1
    h = jnp.maximum(h, 0.0)
    h = h @ w2.T + b2
    return (h + xf).astype(x.dtype)


if __name__ == "__main__":
    key = jax.random.PRNGKey(0)
    k_x, k_x2, k_w1, k_w2 = jax.random.split(key, 4)

    batch, seq, c_resnet = 2, 8, 128   # rows = 16, C = 128

    x = jax.random.normal(k_x, (batch, seq, c_resnet), dtype=jnp.float32)

    # Deterministic parameter init (shapes from __init__):
    #   linear_1: Linear(c, c), init='relu'  -> He-style scaled normal, zero bias
    #   linear_2: Linear(c, c), init='final' -> zeros in the reference module;
    #     use small random values here so the compute path is actually exercised.
    w1 = jax.random.normal(k_w1, (c_resnet, c_resnet), jnp.float32) * (2.0 / c_resnet) ** 0.5
    b1 = jnp.zeros((c_resnet,), jnp.float32)
    w2 = jax.random.normal(k_w2, (c_resnet, c_resnet), jnp.float32) * 0.02
    b2 = jnp.zeros((c_resnet,), jnp.float32)

    # Params prepared once (hoisted off the hot path).
    params = prepare_angle_resnet_params(w1, b1, w2, b2)

    # Case 1: rows divisible by 8.
    out = angle_resnet_block_prepared(x, *params)
    out = jax.block_until_ready(out)
    ref = _reference(x, w1, b1, w2, b2)
    assert out.shape == x.shape and out.dtype == x.dtype
    # Full-f32 matmuls -> tight tolerance vs f32 reference.
    assert jnp.allclose(out, ref, atol=1e-4, rtol=1e-4), "mismatch vs reference (case 1)"

    # Case 2: rows NOT a multiple of 8 -> exercises the masked partial block
    # (no pad/slice in the wrapper).
    x2 = jax.random.normal(k_x2, (batch, 7, c_resnet), dtype=jnp.float32)
    out2 = jax.block_until_ready(angle_resnet_block_prepared(x2, *params))
    ref2 = _reference(x2, w1, b1, w2, b2)
    assert out2.shape == x2.shape and out2.dtype == x2.dtype
    assert jnp.allclose(out2, ref2, atol=1e-4, rtol=1e-4), "mismatch vs reference (case 2)"

    print("KERNEL_OK")
</pallas_src>

<mosaic_0001>
module attributes {stable_mosaic.version = 11 : i64} {
  func.func @_angle_resnet_block_kernel(%arg0: i32, %arg1: memref<16x128xf32, #tpu.memory_space<vmem>>, %arg2: memref<128x128xf32, #tpu.memory_space<vmem>>, %arg3: memref<1x128xf32, #tpu.memory_space<vmem>>, %arg4: memref<128x128xf32, #tpu.memory_space<vmem>>, %arg5: memref<1x128xf32, #tpu.memory_space<vmem>>, %arg6: memref<16x128xf32, #tpu.memory_space<vmem>>) attributes {dimension_semantics = [#tpu.dimension_semantics<parallel>], iteration_bounds = array<i64: 1>, scalar_prefetch = 0 : i64, scratch_operands = 0 : i64, tpu.core_type = #tpu.core_type<tc>, window_params = [{transform_indices = @transform_0, window_bounds = array<i64: 16, 128>}, {pipeline_mode = #tpu.pipeline_mode<synchronous>, transform_indices = @transform_1, window_bounds = array<i64: 128, 128>}, {pipeline_mode = #tpu.pipeline_mode<synchronous>, transform_indices = @transform_2, window_bounds = array<i64: 1, 128>}, {pipeline_mode = #tpu.pipeline_mode<synchronous>, transform_indices = @transform_3, window_bounds = array<i64: 128, 128>}, {pipeline_mode = #tpu.pipeline_mode<synchronous>, transform_indices = @transform_4, window_bounds = array<i64: 1, 128>}, {transform_indices = @transform_5, window_bounds = array<i64: 16, 128>}]} {
    %c0 = arith.constant 0 : index
    %c0_0 = arith.constant 0 : index
    %0 = vector.load %arg1[%c0, %c0_0] : memref<16x128xf32, #tpu.memory_space<vmem>>, vector<16x128xf32>
    %cst = arith.constant 0.000000e+00 : f32
    %1 = vector.broadcast %cst : f32 to vector<16x128xf32>
    %2 = arith.maximumf %0, %1 : vector<16x128xf32>
    %c0_1 = arith.constant 0 : index
    %c0_2 = arith.constant 0 : index
    %3 = vector.load %arg2[%c0_1, %c0_2] : memref<128x128xf32, #tpu.memory_space<vmem>>, vector<128x128xf32>
    %cst_3 = arith.constant dense<0.000000e+00> : vector<16x128xf32>
    %4 = tpu.matmul %2, %3, %cst_3 {dimension_numbers = #tpu.dot_dimension_numbers<[1], [0], [0], [1], [0, 0, 1, 1], [], []>} : vector<16x128xf32>, vector<128x128xf32>, vector<16x128xf32> -> vector<16x128xf32>
    %c0_4 = arith.constant 0 : index
    %c0_5 = arith.constant 0 : index
    %5 = vector.load %arg3[%c0_4, %c0_5] : memref<1x128xf32, #tpu.memory_space<vmem>>, vector<1x128xf32>
    %6 = vector.broadcast %5 : vector<1x128xf32> to vector<16x128xf32>
    %7 = arith.addf %4, %6 : vector<16x128xf32>
    %cst_6 = arith.constant 0.000000e+00 : f32
    %8 = vector.broadcast %cst_6 : f32 to vector<16x128xf32>
    %9 = arith.maximumf %7, %8 : vector<16x128xf32>
    %c0_7 = arith.constant 0 : index
    %c0_8 = arith.constant 0 : index
    %10 = vector.load %arg4[%c0_7, %c0_8] : memref<128x128xf32, #tpu.memory_space<vmem>>, vector<128x128xf32>
    %cst_9 = arith.constant dense<0.000000e+00> : vector<16x128xf32>
    %11 = tpu.matmul %9, %10, %cst_9 {dimension_numbers = #tpu.dot_dimension_numbers<[1], [0], [0], [1], [0, 0, 1, 1], [], []>} : vector<16x128xf32>, vector<128x128xf32>, vector<16x128xf32> -> vector<16x128xf32>
    %c0_10 = arith.constant 0 : index
    %c0_11 = arith.constant 0 : index
    %12 = vector.load %arg5[%c0_10, %c0_11] : memref<1x128xf32, #tpu.memory_space<vmem>>, vector<1x128xf32>
    %13 = vector.broadcast %12 : vector<1x128xf32> to vector<16x128xf32>
    %14 = arith.addf %11, %13 : vector<16x128xf32>
    %c0_12 = arith.constant 0 : index
    %c0_13 = arith.constant 0 : index
    %15 = vector.load %arg1[%c0_12, %c0_13] : memref<16x128xf32, #tpu.memory_space<vmem>>, vector<16x128xf32>
    %16 = arith.addf %14, %15 : vector<16x128xf32>
    %c0_14 = arith.constant 0 : index
    %c0_15 = arith.constant 0 : index
    %17 = vector.load %arg6[%c0_14, %c0_15] : memref<16x128xf32, #tpu.memory_space<vmem>>, vector<16x128xf32>
    tpu.vector_store %arg6[%c0_14, %c0_15], %16 {strides = array<i32>} : memref<16x128xf32, #tpu.memory_space<vmem>>, vector<16x128xf32>,
    return
  }
  func.func @transform_0(%arg0: i32) -> (i32, i32) {
    %c0_i32 = arith.constant 0 : i32
    %c0_i32_0 = arith.constant 0 : i32
    return %arg0, %c0_i32 : i32, i32
  }
  func.func @transform_1(%arg0: i32) -> (i32, i32) {
    %c0_i32 = arith.constant 0 : i32
    %c0_i32_0 = arith.constant 0 : i32
    %c0_i32_1 = arith.constant 0 : i32
    return %c0_i32, %c0_i32_0 : i32, i32
  }
  func.func @transform_2(%arg0: i32) -> (i32, i32) {
    %c0_i32 = arith.constant 0 : i32
    %c0_i32_0 = arith.constant 0 : i32
    %c0_i32_1 = arith.constant 0 : i32
    return %c0_i32, %c0_i32_0 : i32, i32
  }
  func.func @transform_3(%arg0: i32) -> (i32, i32) {
    %c0_i32 = arith.constant 0 : i32
    %c0_i32_0 = arith.constant 0 : i32
    %c0_i32_1 = arith.constant 0 : i32
    return %c0_i32, %c0_i32_0 : i32, i32
  }
  func.func @transform_4(%arg0: i32) -> (i32, i32) {
    %c0_i32 = arith.constant 0 : i32
    %c0_i32_0 = arith.constant 0 : i32
    %c0_i32_1 = arith.constant 0 : i32
    return %c0_i32, %c0_i32_0 : i32, i32
  }
  func.func @transform_5(%arg0: i32) -> (i32, i32) {
    %c0_i32 = arith.constant 0 : i32
    %c0_i32_0 = arith.constant 0 : i32
    return %arg0, %c0_i32 : i32, i32
  }
}

</mosaic_0001>

<bundles_post_ra>
// kernel: tpu_custom_call.1
= control target key start
LH: loop header
LB: loop body
LE: loop exit
PB: predicated region body
PF: predicated region fallthrough
CT: control target
= control target key end

     0   :  { %10 = vsyncpa [#allocation3], 0  ;;  %s671_s0 = inlined_call_operand.hbm [shape: f32[16,128], index: 0, kind: input, shape index: {}]   ;;  %s672_s1 = inlined_call_operand.hbm [shape: f32[128,128], index: 1, kind: input, shape index: {}]   ;;  %s673_s2 = inlined_call_operand.vmem [shape: f32[1,128], index: 2, kind: input, shape index: {}]   ;;  %s674_s3 = inlined_call_operand.hbm [shape: f32[128,128], index: 3, kind: input, shape index: {}]   ;;  %s675_s4 = inlined_call_operand.vmem [shape: f32[1,128], index: 4, kind: input, shape index: {}]   ;;  %s676_s5 = inlined_call_operand.hbm [shape: f32[16,128], index: 5, kind: output, shape index: {}]  }
   0x1   :  { %11 = vsyncpa [#allocation6], 0 }
   0x2   :  { %12 = vsyncpa [#allocation4], 0  ;;  %s558_s18 = smov [#allocation5]   ;;  %s559_s20 = smov [#allocation2]  }
   0x3   :  { %s30_s19 = sshll.u32 %s558_s18, 4  ;;  %s18_s21 = sshll.u32 %s559_s20, 4  ;;  %s31_s19 = int_to_ptr.vmem [resolvable:$true] %s30_s19  ;;  %s594_s21 = int_to_ptr.vmem [resolvable:$true] %s18_s21 }
   0x4   :  { %s464_s24 = scalar_lea.hbm %s672_s1, 2048 }
   0x5   :  { %p465_p0 = scmp.ne.s32.totalorder %s672_s1, %s464_s24  ;;  %p468_p1 = scmp.lt.u32.totalorder %s464_s24, %s672_s1 }
   0x7   :  { %p470_p2 = pnand %p468_p1, %p465_p0 }
   0x9   :  { %473 = shalt.err (!%p470_p2)
}
   0xa   :  { %s474_s29 = scalar_lea.vmem %s31_s19, 2048  ;;  %p479_p4 = scmp.lt.s32.totalorder %s31_s19, %s31_s19 }
   0xb   :  { %p475_p3 = scmp.ne.s32.totalorder %s31_s19, %s474_s29  ;;  %p480_p5 = scmp.lt.s32.totalorder %s474_s29, %s474_s29 }
   0xd   :  { %p481_p6 = por %p480_p5, %p479_p4 }
   0xf   :  { %p482_p7 = pnand %p481_p6, %p475_p3 }
  0x11   :  { %485 = shalt.err (!%p482_p7)
}
  0x12   :  { %s560_s30 = smov 128   ;;  %s561_s6 = smov 8  }
  0x13   :  { %36 = dma.hbm_to_vmem [thread:$0]  %s672_s1, 2048, %s31_s19, [#allocation6], %s560_s30, %s560_s30, %s561_s6  }
  0x14   :  { %s486_s11 = scalar_lea.hbm %s671_s0, 256 }
  0x15   :  { %p487_p8 = scmp.ne.s32.totalorder %s671_s0, %s486_s11  ;;  %p490_p9 = scmp.lt.u32.totalorder %s486_s11, %s671_s0 }
  0x17   :  { %p492_p10 = pnand %p490_p9, %p487_p8 }
  0x19   :  { %495 = shalt.err (!%p492_p10)
}
  0x1a   :  { %s496_s16 = scalar_lea.vmem %s594_s21, 256  ;;  %p501_p12 = scmp.lt.s32.totalorder %s594_s21, %s594_s21 }
  0x1b   :  { %p497_p11 = scmp.ne.s32.totalorder %s594_s21, %s496_s16  ;;  %p502_p13 = scmp.lt.s32.totalorder %s496_s16, %s496_s16 }
  0x1d   :  { %p503_p0 = por %p502_p13, %p501_p12 }
  0x1f   :  { %p504_p1 = pnand %p503_p0, %p497_p11 }
  0x21   :  { %507 = shalt.err (!%p504_p1)
}
  0x22   :  { %24 = dma.hbm_to_vmem [thread:$0]  %s671_s0, 256, %s594_s21, [#allocation3], %s560_s30, %s560_s30, %s561_s6  }
  0x23   :  { %s562_s18 = smov [#allocation7]   ;;  %s508_s23 = scalar_lea.hbm %s674_s3, 2048 }
  0x24   :  { %s44_s19 = sshll.u32 %s562_s18, 4  ;;  %p509_p2 = scmp.ne.s32.totalorder %s674_s3, %s508_s23  ;;  %s45_s19 = int_to_ptr.vmem [resolvable:$true] %s44_s19 }
  0x25   :  { %p512_p3 = scmp.lt.u32.totalorder %s508_s23, %s674_s3 }
  0x27   :  { %p514_p4 = pnand %p512_p3, %p509_p2 }
  0x29   :  { %517 = shalt.err (!%p514_p4)
}
  0x2a   :  { %s518_s28 = scalar_lea.vmem %s45_s19, 2048  ;;  %p523_p6 = scmp.lt.s32.totalorder %s45_s19, %s45_s19 }
  0x2b   :  { %p519_p5 = scmp.ne.s32.totalorder %s45_s19, %s518_s28  ;;  %p524_p7 = scmp.lt.s32.totalorder %s518_s28, %s518_s28 }
  0x2d   :  { %p525_p8 = por %p524_p7, %p523_p6 }
  0x2f   :  { %p526_p9 = pnand %p525_p8, %p519_p5 }
  0x31   :  { %529 = shalt.err (!%p526_p9)
}
  0x32   :  { %50 = dma.hbm_to_vmem [thread:$0]  %s674_s3, 2048, %s45_s19, [#allocation6], %s560_s30, %s560_s30, %s561_s6  }
  0x33   :  { %552 = dma.done.wait [#allocation3], 256  }
  0x34   :  { %553 = vsyncadd [#allocation3], 4294967040 }
  0x35   :  { %554 = dma.done.wait [#allocation6], 4096  }
  0x36   :  { %555 = vsyncadd [#allocation6], 4294963200  ;;  %v66_v0 = vld [vmem:[#allocation5] sm:$0xff]  ;;  %v67_v1 = vld [vmem:[#allocation5 + $0x8] sm:$0xff]  ;;  %s563_s9 = smov [#allocation8]  }
  0x37   :  { %v68_v2 = vld [vmem:[#allocation5 + $0x10] sm:$0xff]  ;;  %v394_v3 = vpack.c.bf16 %v67_v1, %v66_v0  ;;  %v69_v4 = vld [vmem:[#allocation5 + $0x18] sm:$0xff]  ;;  %v70_v6 = vld [vmem:[#allocation5 + $0x20] sm:$0xff]  ;;  %s273_s10 = sshll.u32 %s563_s9, 4  ;;  %s274_s10 = int_to_ptr.vmem [resolvable:$true] %s273_s10 }
  0x38   :  { %v398_v5 = vpack.c.bf16 %v69_v4, %v68_v2  ;;  %v71_v7 = vld [vmem:[#allocation5 + $0x28] sm:$0xff]  ;;  %v72_v9 = vld [vmem:[#allocation5 + $0x30] sm:$0xff]  ;;  %v73_v10 = vld [vmem:[#allocation5 + $0x38] sm:$0xff]  ;;  %p535_p11 = scmp.lt.s32.totalorder %s274_s10, %s274_s10 }
  0x39   :  { %395 = vmatprep.subr.bf16.mxu0 %v394_v3  ;;  %v402_v8 = vpack.c.bf16 %v71_v7, %v70_v6  ;;  %v646_v11 = vld [vmem:[#allocation2] sm:$0xff]  ;;  %v166_v13 = vld [vmem:[#allocation7] sm:$0xff]  ;;  %v167_v14 = vld [vmem:[#allocation7 + $0x8] sm:$0xff]  ;;  %v406_v21 = vpack.c.bf16 %v73_v10, %v72_v9 }
  0x3a   :  { %397 = vmatpush3.bf16.msra.mxu0 %v394_v3  ;;  %v64_v12 = vmax.f32 %v646_v11, 0.0  ;;  %v168_v15 = vld [vmem:[#allocation7 + $0x10] sm:$0xff]  ;;  %v426_v16 = vpack.c.bf16 %v167_v14, %v166_v13  ;;  %v169_v17 = vld [vmem:[#allocation7 + $0x18] sm:$0xff]  ;;  %v170_v19 = vld [vmem:[#allocation7 + $0x20] sm:$0xff] }
  0x3b   :  { %399 = vmatprep.subr.bf16.mxu0 %v398_v5  ;;  %v430_v18 = vpack.c.bf16 %v169_v17, %v168_v15  ;;  %v171_v20 = vld [vmem:[#allocation7 + $0x28] sm:$0xff]  ;;  %v74_v22 = vld [vmem:[#allocation5 + $0x40] sm:$0xff]  ;;  %v172_v25 = vld [vmem:[#allocation7 + $0x30] sm:$0xff] }
  0x3c   :  { %356 = vmatprep.mubr.f32.mxu0 %v64_v12  ;;  %427 = vmatprep.subr.bf16.mxu1 %v426_v16  ;;  %v75_v23 = vld [vmem:[#allocation5 + $0x48] sm:$0xff]  ;;  %v434_v24 = vpack.c.bf16 %v171_v20, %v170_v19  ;;  %v173_v26 = vld [vmem:[#allocation7 + $0x38] sm:$0xff]  ;;  %v76_v28 = vld [vmem:[#allocation5 + $0x50] sm:$0xff] }
  0x3d   :  { %429 = vmatpush3.bf16.msra.mxu1 %v426_v16  ;;  %v410_v27 = vpack.c.bf16 %v75_v23, %v74_v22  ;;  %v77_v29 = vld [vmem:[#allocation5 + $0x58] sm:$0xff]  ;;  %v438_v30 = vpack.c.bf16 %v173_v26, %v172_v25  ;;  %v174_v31 = vld [vmem:[#allocation7 + $0x40] sm:$0xff]  ;;  %v175_v32 = vld [vmem:[#allocation7 + $0x48] sm:$0xff] }
  0x3e   :  { %401 = vmatpush3.bf16.msra.mxu0 %v398_v5  ;;  %431 = vmatprep.subr.bf16.mxu1 %v430_v18  ;;  %v414_v33 = vpack.c.bf16 %v77_v29, %v76_v28  ;;  %v78_v34 = vld [vmem:[#allocation5 + $0x60] sm:$0xff]  ;;  %v79_v35 = vld [vmem:[#allocation5 + $0x68] sm:$0xff]  ;;  %v442_v36 = vpack.c.bf16 %v175_v32, %v174_v31  ;;  %v176_v37 = vld [vmem:[#allocation7 + $0x50] sm:$0xff] }
  0x3f   :  { %403 = vmatprep.subr.bf16.mxu0 %v402_v8  ;;  %v177_v38 = vld [vmem:[#allocation7 + $0x58] sm:$0xff]  ;;  %v418_v39 = vpack.c.bf16 %v79_v35, %v78_v34  ;;  %v80_v40 = vld [vmem:[#allocation5 + $0x70] sm:$0xff]  ;;  %v178_v43 = vld [vmem:[#allocation7 + $0x60] sm:$0xff] }
  0x40   :  { %v81_v41 = vld [vmem:[#allocation5 + $0x78] sm:$0xff]  ;;  %v446_v42 = vpack.c.bf16 %v177_v38, %v176_v37  ;;  %v179_v44 = vld [vmem:[#allocation7 + $0x68] sm:$0xff]  ;;  %v180_v49 = vld [vmem:[#allocation7 + $0x70] sm:$0xff] }
  0x41   :  { %433 = vmatpush3.bf16.msra.mxu1 %v430_v18  ;;  %v422_v45 = vpack.c.bf16 %v81_v41, %v80_v40  ;;  %v450_v46 = vpack.c.bf16 %v179_v44, %v178_v43  ;;  %v63_v47 = vld [vmem:[#allocation2 + $0x8] sm:$0xff]  ;;  %v286_v52 = vld [vmem:[%s673_s2] ss:$0 sm:$0xff]  ;;  %s530_s2 = scalar_lea.vmem %s274_s10, 256 }
  0x42   :  { %405 = vmatpush3.bf16.msra.mxu0 %v402_v8  ;;  %435 = vmatprep.subr.bf16.mxu1 %v434_v24  ;;  %v65_v48 = vmax.f32 %v63_v47, 0.0  ;;  %v181_v50 = vld [vmem:[#allocation7 + $0x78] sm:$0xff]  ;;  %v287_v59 = vld [vmem:[%s675_s4] ss:$0 sm:$0xff]  ;;  %p531_p10 = scmp.ne.s32.totalorder %s274_s10, %s530_s2  ;;  %p536_p12 = scmp.lt.s32.totalorder %s530_s2, %s530_s2 }
  0x43   :  { %407 = vmatprep.subr.bf16.mxu0 %v406_v21  ;;  %v454_v51 = vpack.c.bf16 %v181_v50, %v180_v49 }
  0x44   :  { %p537_p13 = por %p536_p12, %p535_p11 }
  0x45   :  { %437 = vmatpush3.bf16.msra.mxu1 %v434_v24 }
  0x46   :  { %409 = vmatpush3.bf16.msra.mxu0 %v406_v21  ;;  %439 = vmatprep.subr.bf16.mxu1 %v438_v30  ;;  %p538_p0 = pnand %p537_p13, %p531_p10 }
  0x47   :  { %411 = vmatprep.subr.bf16.mxu0 %v410_v27 }
  0x49   :  { %441 = vmatpush3.bf16.msra.mxu1 %v438_v30 }
  0x4a   :  { %413 = vmatpush3.bf16.msra.mxu0 %v410_v27  ;;  %443 = vmatprep.subr.bf16.mxu1 %v442_v36 }
  0x4b   :  { %415 = vmatprep.subr.bf16.mxu0 %v414_v33 }
  0x4d   :  { %445 = vmatpush3.bf16.msra.mxu1 %v442_v36 }
  0x4e   :  { %417 = vmatpush3.bf16.msra.mxu0 %v414_v33  ;;  %447 = vmatprep.subr.bf16.mxu1 %v446_v42 }
  0x4f   :  { %419 = vmatprep.subr.bf16.mxu0 %v418_v39 }
  0x51   :  { %449 = vmatpush3.bf16.msra.mxu1 %v446_v42 }
  0x52   :  { %421 = vmatpush3.bf16.msra.mxu0 %v418_v39  ;;  %451 = vmatprep.subr.bf16.mxu1 %v450_v46 }
  0x53   :  { %423 = vmatprep.subr.bf16.mxu0 %v422_v45 }
  0x55   :  { %453 = vmatpush3.bf16.msra.mxu1 %v450_v46 }
  0x56   :  { %425 = vmatpush3.bf16.msra.mxu0 %v422_v45  ;;  %455 = vmatprep.subr.bf16.mxu1 %v454_v51 }
  0x59   :  { %357 = vmatmul.mubr.f32.vlgmr.msra.gmra.mrb[0].mxu0 %v65_v48  ;;  %457 = vmatpush3.bf16.msra.mxu1 %v454_v51 }
 0x12c   :  { %v358_v53 = vpop.f32.mrb[0].mxu0 }
 0x12d   :  { %v161_v54 = vadd.f32 %v358_v53, %v286_v52  ;;  %v155_v55 = vpop.f32.mrb[1].mxu0 }
 0x12e   :  { %v156_v56 = vadd.f32 %v286_v52, %v155_v55 }
 0x12f   :  { %v165_v58 = vmax.f32 %v161_v54, 0.0 }
 0x130   :  { %v164_v57 = vmax.f32 %v156_v56, 0.0 }
 0x132   :  { %391 = vmatprep.mubr.f32.mxu1 %v164_v57 }
 0x133   :  { %392 = vmatmul.mubr.f32.vlgmr.msra.gmra.mrb[0].mxu1 %v165_v58 }
 0x206   :  { %v393_v60 = vpop.f32.mrb[0].mxu1 }
 0x207   :  { %v261_v61 = vadd.f32 %v393_v60, %v287_v59  ;;  %v255_v62 = vpop.f32.mrb[1].mxu1 }
 0x208   :  { %v256_v63 = vadd.f32 %v287_v59, %v255_v62 }
 0x209   :  { %v265_v0 = vadd.f32 %v261_v61, %v63_v47 }
 0x20a   :  { %v264_v1 = vadd.f32 %v256_v63, %v646_v11 }
 0x20b   :  { %267 = vst [vmem:[#allocation8 + $0x8] sm:$0xff] %v265_v0 }
 0x20c   :  { %266 = vst [vmem:[#allocation8] sm:$0xff] %v264_v1 }
 0x20d   :  { %541 = shalt.err (!%p538_p0)
}
 0x20e   :  { %s542_s12 = scalar_lea.hbm %s676_s5, 256 }
 0x20f   :  { %p543_p1 = scmp.ne.s32.totalorder %s676_s5, %s542_s12  ;;  %p546_p2 = scmp.lt.u32.totalorder %s542_s12, %s676_s5 }
 0x211   :  { %p548_p3 = pnand %p546_p2, %p543_p1 }
 0x213   :  { %551 = shalt.err (!%p548_p3)
}
 0x214   :  { %279 = dma.vmem_to_hbm [thread:$0]  %s274_s10, 256, %s676_s5, [#allocation4], %s560_s30, %s560_s30, %s561_s6  }
 0x215   :  { %556 = dma.done.wait [#allocation4], 256  }
 0x216   :  { %557 = vsyncadd [#allocation4], 4294967040 }
 0x217   :  { %283 = vsyncpa [#allocation3], 1 }
 0x218   :  { %284 = vsyncpa [#allocation6], 1 }
 0x219   :  { %285 = vsyncpa [#allocation4], 1 }

</bundles_post_ra>
